<compile_context>
chip_gen: v7x
topology: tpu7x:2x2x1
jax: 0.10.0
libtpu: 0.0.40
codegen_flags: <defaults>
</compile_context>

<pallas_src>
import jax
import jax.numpy as jnp
from jax.experimental import pallas as pl
from jax.experimental.pallas import tpu as pltpu


def _round_up(x, m):
    return (x + m - 1) // m * m


# ----------------------------- Tiled matmul + bias ----------------------------

def _linear_bias_kernel(x_ref, w_ref, b_ref, o_ref):
    o_ref[...] = (jnp.dot(x_ref[...], w_ref[...],
                          preferred_element_type=jnp.float32)
                  + b_ref[...]).astype(o_ref.dtype)


def linear_tiled(x2d, w_t, bias, *, out_dtype=jnp.float32, tile_n=256, tile_v=512):
    """x2d: (N, K); w_t: (K, V); bias: (V,). Returns (N, V) in out_dtype.

    Grid over (N tiles, V tiles); K kept as a single block (fine for K up to a
    few thousand).  Both output axes are 'parallel' so megacore chips can shard.
    """
    N, K = x2d.shape
    V = w_t.shape[1]
    tile_n = min(tile_n, _round_up(N, 8))
    tile_v = min(tile_v, _round_up(V, 128))
    Np, Vp = _round_up(N, tile_n), _round_up(V, tile_v)
    if Np != N:
        x2d = jnp.pad(x2d, ((0, Np - N), (0, 0)))
    if Vp != V:
        w_t = jnp.pad(w_t, ((0, 0), (0, Vp - V)))
        bias = jnp.pad(bias, ((0, Vp - V),))
    bias2 = bias.astype(jnp.float32)[None, :]           # (1, Vp)

    bytes_accessed = (Np * K * x2d.dtype.itemsize
                      + K * Vp * w_t.dtype.itemsize
                      + Np * Vp * jnp.dtype(out_dtype).itemsize)
    out = pl.pallas_call(
        _linear_bias_kernel,
        out_shape=jax.ShapeDtypeStruct((Np, Vp), out_dtype),
        grid_spec=pltpu.PrefetchScalarGridSpec(
            num_scalar_prefetch=0,
            grid=(Np // tile_n, Vp // tile_v),
            in_specs=[
                pl.BlockSpec((tile_n, K), lambda i, j: (i, 0)),
                pl.BlockSpec((K, tile_v), lambda i, j: (0, j)),
                pl.BlockSpec((1, tile_v), lambda i, j: (0, j)),
            ],
            out_specs=pl.BlockSpec((tile_n, tile_v), lambda i, j: (i, j)),
        ),
        compiler_params=pltpu.CompilerParams(
            dimension_semantics=("parallel", "parallel")),
        cost_estimate=pl.CostEstimate(
            flops=2 * Np * K * Vp,
            transcendentals=0,
            bytes_accessed=bytes_accessed),
    )(x2d, w_t, bias2)
    return out[:N, :V]


# ----------------------------- LSTM recurrence kernel -------------------------

def _lstm_recurrent_kernel(gin_ref, whh_ref, y_ref, h_scr, c_scr):
    """One grid step = one chunk of time steps.

    gin_ref: (TC, B, 4H) f32   precomputed x@W_ih^T + b_ih + b_hh
    whh_ref: (H, 4H)     bf16  recurrent weights (constant block index -> resident)
    y_ref  : (TC, B, H)  bf16  hidden-state outputs
    h/c scratch persist across grid steps.  Gate order: i, f, g, o (PyTorch).
    """
    @pl.when(pl.program_id(0) == 0)
    def _():
        h_scr[...] = jnp.zeros_like(h_scr)
        c_scr[...] = jnp.zeros_like(c_scr)

    H = h_scr.shape[-1]
    h = h_scr[...]
    c = c_scr[...]
    TC = gin_ref.shape[0]
    for s in range(TC):   # small static chunk -> fully unrolled, constant indices
        gates = gin_ref[s] + jnp.dot(h.astype(jnp.bfloat16), whh_ref[...],
                                     preferred_element_type=jnp.float32)
        i_g = jax.nn.sigmoid(gates[:, 0 * H:1 * H])
        f_g = jax.nn.sigmoid(gates[:, 1 * H:2 * H])
        g_g = jnp.tanh(gates[:, 2 * H:3 * H])
        o_g = jax.nn.sigmoid(gates[:, 3 * H:4 * H])
        c = f_g * c + i_g * g_g          # f32 elementwise state math (v5e safe)
        h = o_g * jnp.tanh(c)
        y_ref[s] = h.astype(y_ref.dtype)
    h_scr[...] = h
    c_scr[...] = c


def lstm_recurrence(gates_in, whh_t, time_chunk):
    """gates_in: (Tp, Bp, 4H) f32; whh_t: (H, 4H) bf16. Returns (Tp, Bp, H) bf16."""
    Tp, Bp, G = gates_in.shape
    H = G // 4
    n_chunks = Tp // time_chunk
    flops = Tp * (2 * Bp * H * G + 10 * Bp * H)
    bytes_accessed = Tp * Bp * G * 4 + H * G * 2 + Tp * Bp * H * 2
    return pl.pallas_call(
        _lstm_recurrent_kernel,
        out_shape=jax.ShapeDtypeStruct((Tp, Bp, H), jnp.bfloat16),
        grid_spec=pltpu.PrefetchScalarGridSpec(
            num_scalar_prefetch=0,
            grid=(n_chunks,),
            in_specs=[
                pl.BlockSpec((time_chunk, Bp, G), lambda t: (t, 0, 0)),
                # Constant block index: W_hh stays resident in VMEM (bf16 halves
                # the footprint, which matters most under v7x's 64 MiB budget).
                pl.BlockSpec((H, G), lambda t: (0, 0)),
            ],
            out_specs=pl.BlockSpec((time_chunk, Bp, H), lambda t: (t, 0, 0)),
            scratch_shapes=[
                pltpu.VMEM((Bp, H), jnp.float32),   # h state
                pltpu.VMEM((Bp, H), jnp.float32),   # c state
            ],
        ),
        compiler_params=pltpu.CompilerParams(
            dimension_semantics=("arbitrary",)),    # serial recurrence
        cost_estimate=pl.CostEstimate(
            flops=flops,
            transcendentals=5 * Tp * Bp * H,
            bytes_accessed=bytes_accessed),
    )(gates_in, whh_t)


def lstm_layer(x, w_ih, w_hh, b_ih, b_hh, *, time_chunk):
    """x: (Tp, Bp, in) bf16 (padded/aligned). Returns (Tp, Bp, H) bf16."""
    Tp, Bp, _ = x.shape
    H = w_hh.shape[1]
    wih_t = jnp.asarray(w_ih, jnp.bfloat16).T        # (in, 4H)  bf16 MXU operand
    whh_t = jnp.asarray(w_hh, jnp.bfloat16).T        # (H, 4H)   bf16 MXU operand
    bias = (b_ih + b_hh).astype(jnp.float32)         # (4H,)     f32

    # Hoisted input projection: one big grid-parallel MXU matmul over all Tp*Bp
    # rows instead of Tp tiny matmuls inside the serial loop.
    gates_in = linear_tiled(x.reshape(Tp * Bp, -1), wih_t, bias,
                            out_dtype=jnp.float32)
    gates_in = gates_in.reshape(Tp, Bp, 4 * H)
    return lstm_recurrence(gates_in, whh_t, time_chunk)


# ----------------------------- Full model forward ------------------------------

def init_params(key, vocab_size, embed_size, hidden_size, num_layers):
    ks = jax.random.split(key, 2 + 4 * num_layers)
    k = 1.0 / jnp.sqrt(hidden_size)
    params = {
        "embed": jax.random.normal(ks[0], (vocab_size, embed_size), jnp.float32),
        "linear_w": jax.random.uniform(ks[1], (vocab_size, hidden_size),
                                       jnp.float32, -k, k),
        "linear_b": jnp.zeros((vocab_size,), jnp.float32),
        "lstm": [],
    }
    for l in range(num_layers):
        in_size = embed_size if l == 0 else hidden_size
        kk = ks[2 + 4 * l: 2 + 4 * (l + 1)]
        params["lstm"].append({
            "w_ih": jax.random.uniform(kk[0], (4 * hidden_size, in_size),
                                       jnp.float32, -k, k),
            "w_hh": jax.random.uniform(kk[1], (4 * hidden_size, hidden_size),
                                       jnp.float32, -k, k),
            "b_ih": jax.random.uniform(kk[2], (4 * hidden_size,),
                                       jnp.float32, -k, k),
            "b_hh": jax.random.uniform(kk[3], (4 * hidden_size,),
                                       jnp.float32, -k, k),
        })
    return params


def rnn_efficientnet_forward(params, features, captions, *, time_chunk=8):
    """features: (B, E) f32; captions: (T, B) int32. Returns (T+1, B, V) f32."""
    # Embedding gather + prepend image features (glue in plain JAX; tiny table).
    emb = jnp.take(params["embed"], captions, axis=0)            # (T, B, E)
    x = jnp.concatenate([features[None, :, :], emb], axis=0)     # (T+1, B, E)
    Tp1, B, _ = x.shape

    # vreg alignment: batch padded to a multiple of 8 sublanes; time padded to a
    # multiple of the chunk size.  Padded rows/steps are independent / trailing,
    # so real outputs are unaffected and sliced back out at the end.
    tc = min(time_chunk, Tp1)
    Bp = _round_up(B, 8)
    Tp = _round_up(Tp1, tc)
    x = jnp.pad(x, ((0, Tp - Tp1), (0, Bp - B), (0, 0))).astype(jnp.bfloat16)

    for layer in params["lstm"]:
        x = lstm_layer(x, layer["w_ih"], layer["w_hh"],
                       layer["b_ih"], layer["b_hh"], time_chunk=tc)  # (Tp,Bp,H)

    H = x.shape[-1]
    h2d = x[:Tp1, :B].reshape(Tp1 * B, H)                        # bf16
    lin_wt = jnp.asarray(params["linear_w"], jnp.bfloat16).T     # (H, V) bf16
    logits = linear_tiled(h2d, lin_wt, params["linear_b"],
                          out_dtype=jnp.float32)                 # (Tp1*B, V)
    return logits.reshape(Tp1, B, -1)


# ----------------------------- Pure-JAX reference ------------------------------

def _reference_forward(params, features, captions):
    emb = jnp.take(params["embed"], captions, axis=0)
    x = jnp.concatenate([features[None, :, :], emb], axis=0)
    for layer in params["lstm"]:
        H = layer["w_hh"].shape[1]
        B = x.shape[1]

        def step(carry, x_t, layer=layer, H=H):
            h, c = carry
            gates = (x_t @ layer["w_ih"].T + h @ layer["w_hh"].T
                     + layer["b_ih"] + layer["b_hh"])
            i = jax.nn.sigmoid(gates[:, 0 * H:1 * H])
            f = jax.nn.sigmoid(gates[:, 1 * H:2 * H])
            g = jnp.tanh(gates[:, 2 * H:3 * H])
            o = jax.nn.sigmoid(gates[:, 3 * H:4 * H])
            c = f * c + i * g
            h = o * jnp.tanh(c)
            return (h, c), h

        init = (jnp.zeros((B, H), jnp.float32), jnp.zeros((B, H), jnp.float32))
        _, x = jax.lax.scan(step, init, x)
    return x @ params["linear_w"].T + params["linear_b"]


if __name__ == "__main__":
    # Small but vreg-aligned demo shapes (B multiple of 8; E/H/V multiples of 128).
    vocab_size, embed_size, hidden_size, num_layers = 256, 128, 128, 2
    B, T = 8, 8

    key = jax.random.PRNGKey(0)
    k_param, k_feat, k_cap = jax.random.split(key, 3)

    params = init_params(k_param, vocab_size, embed_size, hidden_size, num_layers)
    features = jax.random.normal(k_feat, (B, embed_size), jnp.float32)
    captions = jax.random.randint(k_cap, (T, B), 0, vocab_size, jnp.int32)

    out = jax.block_until_ready(rnn_efficientnet_forward(params, features, captions))

    assert out.shape == (T + 1, B, vocab_size), out.shape
    assert bool(jnp.all(jnp.isfinite(out)))

    # bf16 MXU operands vs f32 reference: loose tolerance.
    ref = jax.block_until_ready(_reference_forward(params, features, captions))
    max_err = float(jnp.max(jnp.abs(out - ref)))
    assert max_err < 1e-1, max_err

    print("KERNEL_OK")
</pallas_src>

<mosaic_0001>
module attributes {stable_mosaic.version = 11 : i64} {
  func.func @_linear_bias_kernel(%arg0: i32, %arg1: i32, %arg2: memref<128x128xbf16, #tpu.memory_space<vmem>>, %arg3: memref<128x512xbf16, #tpu.memory_space<vmem>>, %arg4: memref<1x512xf32, #tpu.memory_space<vmem>>, %arg5: memref<128x512xf32, #tpu.memory_space<vmem>>) attributes {dimension_semantics = [#tpu.dimension_semantics<parallel>, #tpu.dimension_semantics<parallel>], iteration_bounds = array<i64: 1, 1>, scalar_prefetch = 0 : i64, scratch_operands = 0 : i64, tpu.core_type = #tpu.core_type<tc>, window_params = [{transform_indices = @transform_0, window_bounds = array<i64: 128, 128>}, {transform_indices = @transform_1, window_bounds = array<i64: 128, 512>}, {transform_indices = @transform_2, window_bounds = array<i64: 1, 512>}, {transform_indices = @transform_3, window_bounds = array<i64: 128, 512>}]} {
    %c0 = arith.constant 0 : index
    %c0_0 = arith.constant 0 : index
    %0 = vector.load %arg2[%c0, %c0_0] : memref<128x128xbf16, #tpu.memory_space<vmem>>, vector<128x128xbf16>
    %c0_1 = arith.constant 0 : index
    %c0_2 = arith.constant 0 : index
    %1 = vector.load %arg3[%c0_1, %c0_2] : memref<128x512xbf16, #tpu.memory_space<vmem>>, vector<128x512xbf16>
    %cst = arith.constant dense<0.000000e+00> : vector<128x512xf32>
    %2 = tpu.matmul %0, %1, %cst {dimension_numbers = #tpu.dot_dimension_numbers<[1], [0], [0], [1], [0, 0, 1, 1], [], []>} : vector<128x128xbf16>, vector<128x512xbf16>, vector<128x512xf32> -> vector<128x512xf32>
    %c0_3 = arith.constant 0 : index
    %c0_4 = arith.constant 0 : index
    %3 = vector.load %arg4[%c0_3, %c0_4] : memref<1x512xf32, #tpu.memory_space<vmem>>, vector<1x512xf32>
    %4 = vector.broadcast %3 : vector<1x512xf32> to vector<128x512xf32>
    %5 = arith.addf %2, %4 : vector<128x512xf32>
    %c0_5 = arith.constant 0 : index
    %c0_6 = arith.constant 0 : index
    %6 = vector.load %arg5[%c0_5, %c0_6] : memref<128x512xf32, #tpu.memory_space<vmem>>, vector<128x512xf32>
    tpu.vector_store %arg5[%c0_5, %c0_6], %5 {strides = array<i32>} : memref<128x512xf32, #tpu.memory_space<vmem>>, vector<128x512xf32>,
    return
  }
  func.func @transform_0(%arg0: i32, %arg1: i32) -> (i32, i32) {
    %c0_i32 = arith.constant 0 : i32
    %c0_i32_0 = arith.constant 0 : i32
    return %arg0, %c0_i32 : i32, i32
  }
  func.func @transform_1(%arg0: i32, %arg1: i32) -> (i32, i32) {
    %c0_i32 = arith.constant 0 : i32
    %c0_i32_0 = arith.constant 0 : i32
    return %c0_i32, %arg1 : i32, i32
  }
  func.func @transform_2(%arg0: i32, %arg1: i32) -> (i32, i32) {
    %c0_i32 = arith.constant 0 : i32
    %c0_i32_0 = arith.constant 0 : i32
    return %c0_i32, %arg1 : i32, i32
  }
  func.func @transform_3(%arg0: i32, %arg1: i32) -> (i32, i32) {
    %c0_i32 = arith.constant 0 : i32
    return %arg0, %arg1 : i32, i32
  }
}

</mosaic_0001>

<bundles_post_ra>
// kernel: tpu_custom_call.1
= control target key start
LH: loop header
LB: loop body
LE: loop exit
PB: predicated region body
PF: predicated region fallthrough
CT: control target
= control target key end

     0   :  { %8 = vsyncpa [#allocation3], 0  ;;  %s965_s0 = inlined_call_operand.hbm [shape: bf16[128,128], index: 0, kind: input, shape index: {}]   ;;  %s966_s1 = inlined_call_operand.hbm [shape: bf16[128,512], index: 1, kind: input, shape index: {}]   ;;  %s967_s2 = inlined_call_operand.vmem [shape: f32[1,512], index: 2, kind: input, shape index: {}]   ;;  %s968_s3 = inlined_call_operand.hbm [shape: f32[128,512], index: 3, kind: output, shape index: {}]  }
   0x1   :  { %9 = vsyncpa [#allocation6], 0 }
   0x2   :  { %10 = vsyncpa [#allocation4], 0  ;;  %s808_s12 = smov [#allocation2]   ;;  %s736_s16 = scalar_lea.hbm %s965_s0, 1024 }
   0x3   :  { %s16_s13 = sshll.u32 %s808_s12, 4  ;;  %p737_p0 = scmp.ne.s32.totalorder %s965_s0, %s736_s16  ;;  %s17_s13 = int_to_ptr.vmem [resolvable:$true] %s16_s13 }
   0x4   :  { %p740_p1 = scmp.lt.u32.totalorder %s736_s16, %s965_s0 }
   0x6   :  { %p742_p2 = pnand %p740_p1, %p737_p0 }
   0x8   :  { %745 = shalt.err (!%p742_p2)
}
   0x9   :  { %s746_s21 = scalar_lea.vmem %s17_s13, 1024  ;;  %p751_p4 = scmp.lt.s32.totalorder %s17_s13, %s17_s13 }
   0xa   :  { %p747_p3 = scmp.ne.s32.totalorder %s17_s13, %s746_s21  ;;  %p752_p5 = scmp.lt.s32.totalorder %s746_s21, %s746_s21 }
   0xc   :  { %p753_p6 = por %p752_p5, %p751_p4 }
   0xe   :  { %p754_p7 = pnand %p753_p6, %p747_p3 }
  0x10   :  { %757 = shalt.err (!%p754_p7)
}
  0x11   :  { %s809_s22 = smov 64   ;;  %s810_s23 = smov 4  }
  0x12   :  { %22 = dma.hbm_to_vmem [thread:$0]  %s965_s0, 1024, %s17_s13, [#allocation3], %s809_s22, %s809_s22, %s810_s23  }
  0x13   :  { %s811_s26 = smov [#allocation5]   ;;  %s758_s30 = scalar_lea.hbm %s966_s1, 4096 }
  0x14   :  { %s28_s27 = sshll.u32 %s811_s26, 4  ;;  %p759_p8 = scmp.ne.s32.totalorder %s966_s1, %s758_s30  ;;  %s29_s27 = int_to_ptr.vmem [resolvable:$true] %s28_s27 }
  0x15   :  { %p762_p9 = scmp.lt.u32.totalorder %s758_s30, %s966_s1 }
  0x17   :  { %p764_p10 = pnand %p762_p9, %p759_p8 }
  0x19   :  { %767 = shalt.err (!%p764_p10)
}
  0x1a   :  { %s768_s8 = scalar_lea.vmem %s29_s27, 4096  ;;  %p773_p12 = scmp.lt.s32.totalorder %s29_s27, %s29_s27 }
  0x1b   :  { %p769_p11 = scmp.ne.s32.totalorder %s29_s27, %s768_s8  ;;  %p774_p13 = scmp.lt.s32.totalorder %s768_s8, %s768_s8 }
  0x1d   :  { %p775_p0 = por %p774_p13, %p773_p12 }
  0x1f   :  { %p776_p1 = pnand %p775_p0, %p769_p11 }
  0x21   :  { %779 = shalt.err (!%p776_p1)
}
  0x22   :  { %s812_s0 = smov 256   ;;  %s813_s9 = smov 16  }
  0x23   :  { %34 = dma.hbm_to_vmem [thread:$0]  %s966_s1, 4096, %s29_s27, [#allocation6], %s812_s0, %s812_s0, %s813_s9  }
  0x24   :  { %802 = dma.done.wait [#allocation3], 1024  }
  0x25   :  { %803 = vsyncadd [#allocation3], 4294966272 }
  0x26   :  { %804 = dma.done.wait [#allocation6], 4096  }
  0x27   :  { %805 = vsyncadd [#allocation6], 4294963200  ;;  %v814_v0 = vmov 0   ;;  %v680_v1 = vld [vmem:[#allocation5 + $0x4] ss:$16 sps:$4 sm:$0xff]   ;;  %v729_v34 = vld [vmem:[#allocation2 + $0x8] sm:$0xff]   ;;  %v94_v41 = vlaneseq }
  0x28   :  { %354 = vmatprep.mubr.bf16.mxu0 %v814_v0  ;;  %467 = vmatprep.mubr.bf16.mxu1 %v814_v0  ;;  %v682_v2 = vld [vmem:[#allocation5 + $0xc] ss:$16 sps:$4 sm:$0xff]   ;;  %v684_v3 = vld [vmem:[#allocation5] ss:$16 sps:$4 sm:$0xff]   ;;  %v685_v4 = vld [vmem:[#allocation5 + $0x8] ss:$16 sps:$4 sm:$0xff]  }
  0x29   :  { %322 = vmatprep.subr.bf16.mxu0 %v680_v1  ;;  %435 = vmatprep.subr.bf16.mxu1 %v682_v2  ;;  %v686_v5 = vld [vmem:[#allocation5 + $0x24] ss:$16 sps:$4 sm:$0xff]   ;;  %v688_v6 = vld [vmem:[#allocation5 + $0x2c] ss:$16 sps:$4 sm:$0xff]   ;;  %v690_v7 = vld [vmem:[#allocation5 + $0x20] ss:$16 sps:$4 sm:$0xff]  }
  0x2a   :  { %323 = vmatpush1.bf16.msra.mxu0 %v684_v3  ;;  %436 = vmatpush1.bf16.msra.mxu1 %v685_v4  ;;  %v691_v8 = vld [vmem:[#allocation5 + $0x28] ss:$16 sps:$4 sm:$0xff]   ;;  %v692_v9 = vld [vmem:[#allocation5 + $0x44] ss:$16 sps:$4 sm:$0xff]   ;;  %v694_v10 = vld [vmem:[#allocation5 + $0x4c] ss:$16 sps:$4 sm:$0xff]  }
  0x2b   :  { %324 = vmatprep.subr.bf16.mxu0 %v686_v5  ;;  %437 = vmatprep.subr.bf16.mxu1 %v688_v6  ;;  %v696_v11 = vld [vmem:[#allocation5 + $0x40] ss:$16 sps:$4 sm:$0xff]   ;;  %v697_v12 = vld [vmem:[#allocation5 + $0x48] ss:$16 sps:$4 sm:$0xff]   ;;  %v698_v13 = vld [vmem:[#allocation5 + $0x64] ss:$16 sps:$4 sm:$0xff]  }
  0x2c   :  { %v700_v14 = vld [vmem:[#allocation5 + $0x6c] ss:$16 sps:$4 sm:$0xff]   ;;  %v702_v15 = vld [vmem:[#allocation5 + $0x60] ss:$16 sps:$4 sm:$0xff]   ;;  %v703_v16 = vld [vmem:[#allocation5 + $0x68] ss:$16 sps:$4 sm:$0xff]  }
  0x2d   :  { %v704_v17 = vld [vmem:[#allocation5 + $0x84] ss:$16 sps:$4 sm:$0xff]   ;;  %v706_v18 = vld [vmem:[#allocation5 + $0x8c] ss:$16 sps:$4 sm:$0xff]   ;;  %v708_v19 = vld [vmem:[#allocation5 + $0x80] ss:$16 sps:$4 sm:$0xff]  }
  0x2e   :  { %325 = vmatpush1.bf16.msra.mxu0 %v690_v7  ;;  %438 = vmatpush1.bf16.msra.mxu1 %v691_v8  ;;  %v709_v20 = vld [vmem:[#allocation5 + $0x88] ss:$16 sps:$4 sm:$0xff]   ;;  %v710_v21 = vld [vmem:[#allocation5 + $0xa4] ss:$16 sps:$4 sm:$0xff]   ;;  %v712_v22 = vld [vmem:[#allocation5 + $0xac] ss:$16 sps:$4 sm:$0xff]  }
  0x2f   :  { %326 = vmatprep.subr.bf16.mxu0 %v692_v9  ;;  %439 = vmatprep.subr.bf16.mxu1 %v694_v10  ;;  %v714_v23 = vld [vmem:[#allocation5 + $0xa0] ss:$16 sps:$4 sm:$0xff]   ;;  %v715_v24 = vld [vmem:[#allocation5 + $0xa8] ss:$16 sps:$4 sm:$0xff]   ;;  %v716_v25 = vld [vmem:[#allocation5 + $0xc4] ss:$16 sps:$4 sm:$0xff]  }
  0x30   :  { %v718_v26 = vld [vmem:[#allocation5 + $0xcc] ss:$16 sps:$4 sm:$0xff]   ;;  %v720_v27 = vld [vmem:[#allocation5 + $0xc0] ss:$16 sps:$4 sm:$0xff]   ;;  %v721_v28 = vld [vmem:[#allocation5 + $0xc8] ss:$16 sps:$4 sm:$0xff]  }
  0x31   :  { %v722_v29 = vld [vmem:[#allocation5 + $0xe4] ss:$16 sps:$4 sm:$0xff]   ;;  %v724_v30 = vld [vmem:[#allocation5 + $0xec] ss:$16 sps:$4 sm:$0xff]   ;;  %v726_v31 = vld [vmem:[#allocation5 + $0xe0] ss:$16 sps:$4 sm:$0xff]  }
  0x32   :  { %327 = vmatpush1.bf16.msra.mxu0 %v696_v11  ;;  %440 = vmatpush1.bf16.msra.mxu1 %v697_v12  ;;  %v727_v32 = vld [vmem:[#allocation5 + $0xe8] ss:$16 sps:$4 sm:$0xff]   ;;  %v728_v33 = vld [vmem:[#allocation2] sm:$0xff]   ;;  %v730_v35 = vld [vmem:[#allocation2 + $0x10] sm:$0xff]   ;;  %v95_v42 = vshrl.u32 %v94_v41, 7 }
  0x33   :  { %328 = vmatprep.subr.bf16.mxu0 %v698_v13  ;;  %441 = vmatprep.subr.bf16.mxu1 %v700_v14  ;;  %v731_v36 = vld [vmem:[#allocation2 + $0x18] sm:$0xff]   ;;  %v732_v37 = vld [vmem:[#allocation2 + $0x20] sm:$0xff]   ;;  %v733_v38 = vld [vmem:[#allocation2 + $0x28] sm:$0xff]  }
  0x34   :  { %v734_v39 = vld [vmem:[#allocation2 + $0x30] sm:$0xff]   ;;  %v735_v40 = vld [vmem:[#allocation2 + $0x38] sm:$0xff]   ;;  %v96_v43 = vsub.s32 0, %v95_v42  ;;  %v104_v44 = vsub.s32 2, %v95_v42  ;;  %v92_v45 = vld [vmem:[%s967_s2] sm:$0xf] }
  0x35   :  { %v100_v46 = vsub.s32 1, %v95_v42  ;;  %v108_v47 = vsub.s32 3, %v95_v42  ;;  %s815_s2 = smov [#allocation7]  }
  0x36   :  { %329 = vmatpush1.bf16.msra.mxu0 %v702_v15  ;;  %442 = vmatpush1.bf16.msra.mxu1 %v703_v16  ;;  %v881_v48 = vrot.slane %v92_v45, %v96_v43  ;;  %v883_v49 = vrot.slane %v92_v45, %v104_v44  ;;  %s617_s13 = sshll.u32 %s815_s2, 4  ;;  %s618_s13 = int_to_ptr.vmem [resolvable:$true] %s617_s13 }
  0x37   :  { %330 = vmatprep.subr.bf16.mxu0 %v704_v17  ;;  %443 = vmatprep.subr.bf16.mxu1 %v706_v18  ;;  %v885_v50 = vrot.slane %v92_v45, %v100_v46  ;;  %v887_v51 = vrot.slane %v92_v45, %v108_v47  ;;  %s780_s14 = scalar_lea.vmem %s618_s13, 8192  ;;  %p785_p3 = scmp.lt.s32.totalorder %s618_s13, %s618_s13 }
  0x38   :  { %p781_p2 = scmp.ne.s32.totalorder %s618_s13, %s780_s14  ;;  %p786_p4 = scmp.lt.s32.totalorder %s780_s14, %s780_s14 }
  0x3a   :  { %331 = vmatpush1.bf16.msra.mxu0 %v708_v19  ;;  %444 = vmatpush1.bf16.msra.mxu1 %v709_v20  ;;  %p787_p5 = por %p786_p4, %p785_p3 }
  0x3b   :  { %332 = vmatprep.subr.bf16.mxu0 %v710_v21  ;;  %445 = vmatprep.subr.bf16.mxu1 %v712_v22 }
  0x3c   :  { %p788_p6 = pnand %p787_p5, %p781_p2 }
  0x3e   :  { %333 = vmatpush1.bf16.msra.mxu0 %v714_v23  ;;  %446 = vmatpush1.bf16.msra.mxu1 %v715_v24 }
  0x3f   :  { %334 = vmatprep.subr.bf16.mxu0 %v716_v25  ;;  %447 = vmatprep.subr.bf16.mxu1 %v718_v26 }
  0x42   :  { %335 = vmatpush1.bf16.msra.mxu0 %v720_v27  ;;  %448 = vmatpush1.bf16.msra.mxu1 %v721_v28 }
  0x43   :  { %336 = vmatprep.subr.bf16.mxu0 %v722_v29  ;;  %449 = vmatprep.subr.bf16.mxu1 %v724_v30 }
  0x46   :  { %337 = vmatpush1.bf16.msra.mxu0 %v726_v31  ;;  %450 = vmatpush1.bf16.msra.mxu1 %v727_v32 }
  0x49   :  { %355 = vmatmul.mubr.bf16.vlgmr.msra.gmra.mrb[0].mxu0 %v728_v33  ;;  %468 = vmatmul.mubr.bf16.vlgmr.msra.gmra.mrb[0].mxu1 %v728_v33 }
  0x4a   :  { %364 = vmatprep.mubr.bf16.mxu0 %v814_v0  ;;  %477 = vmatprep.mubr.bf16.mxu1 %v814_v0 }
  0x51   :  { %365 = vmatmul.mubr.bf16.gmra.mrb[4].mxu0 %v729_v34  ;;  %478 = vmatmul.mubr.bf16.gmra.mrb[4].mxu1 %v729_v34 }
  0x52   :  { %374 = vmatprep.mubr.bf16.mxu0 %v814_v0  ;;  %487 = vmatprep.mubr.bf16.mxu1 %v814_v0 }
  0x59   :  { %375 = vmatmul.mubr.bf16.gmra.mrb[8].mxu0 %v730_v35  ;;  %488 = vmatmul.mubr.bf16.gmra.mrb[8].mxu1 %v730_v35 }
  0x5a   :  { %384 = vmatprep.mubr.bf16.mxu0 %v814_v0  ;;  %497 = vmatprep.mubr.bf16.mxu1 %v814_v0 }
  0x61   :  { %385 = vmatmul.mubr.bf16.gmra.mrb[12].mxu0 %v731_v36  ;;  %498 = vmatmul.mubr.bf16.gmra.mrb[12].mxu1 %v731_v36 }
  0x62   :  { %394 = vmatprep.mubr.bf16.mxu0 %v814_v0  ;;  %507 = vmatprep.mubr.bf16.mxu1 %v814_v0 }
  0x69   :  { %395 = vmatmul.mubr.bf16.gmra.mrb[16].mxu0 %v732_v37  ;;  %508 = vmatmul.mubr.bf16.gmra.mrb[16].mxu1 %v732_v37 }
  0x6a   :  { %404 = vmatprep.mubr.bf16.mxu0 %v814_v0  ;;  %517 = vmatprep.mubr.bf16.mxu1 %v814_v0 }
  0x71   :  { %405 = vmatmul.mubr.bf16.gmra.mrb[20].mxu0 %v733_v38  ;;  %518 = vmatmul.mubr.bf16.gmra.mrb[20].mxu1 %v733_v38 }
  0x72   :  { %414 = vmatprep.mubr.bf16.mxu0 %v814_v0  ;;  %527 = vmatprep.mubr.bf16.mxu1 %v814_v0 }
  0x79   :  { %415 = vmatmul.mubr.bf16.gmra.mrb[24].mxu0 %v734_v39  ;;  %528 = vmatmul.mubr.bf16.gmra.mrb[24].mxu1 %v734_v39 }
  0x7a   :  { %424 = vmatprep.mubr.bf16.mxu0 %v814_v0  ;;  %537 = vmatprep.mubr.bf16.mxu1 %v814_v0 }
  0x81   :  { %425 = vmatmul.mubr.bf16.gmra.mrb[28].mxu0 %v735_v40  ;;  %538 = vmatmul.mubr.bf16.gmra.mrb[28].mxu1 %v735_v40 }
 0x11c   :  { %v356_v52 = vpop.f32.mrb[0].mxu0  ;;  %v469_v53 = vpop.f32.mrb[0].mxu1 }
 0x11d   :  { %v357_v54 = vadd.f32 %v356_v52, %v881_v48  ;;  %v470_v55 = vadd.f32 %v469_v53, %v883_v49  ;;  %v358_v56 = vpop.f32.mrb[1].mxu0  ;;  %v471_v57 = vpop.f32.mrb[1].mxu1 }
 0x11e   :  { %v359_v58 = vadd.f32 %v358_v56, %v885_v50  ;;  %v472_v59 = vadd.f32 %v471_v57, %v887_v51  ;;  %v360_v60 = vpop.f32.mrb[2].mxu0  ;;  %v473_v61 = vpop.f32.mrb[2].mxu1 }
 0x11f   :  { %548 = vst [vmem:[#allocation7] sm:$0xff] %v357_v54  ;;  %550 = vst [vmem:[#allocation7 + $0x10] sm:$0xff] %v470_v55  ;;  %v361_v62 = vadd.f32 %v360_v60, %v881_v48  ;;  %v474_v63 = vadd.f32 %v473_v61, %v883_v49  ;;  %v362_v0 = vpop.f32.mrb[3].mxu0  ;;  %v475_v1 = vpop.f32.mrb[3].mxu1 }
 0x120   :  { %549 = vst [vmem:[#allocation7 + $0x8] sm:$0xff] %v359_v58  ;;  %551 = vst [vmem:[#allocation7 + $0x18] sm:$0xff] %v472_v59  ;;  %v363_v2 = vadd.f32 %v362_v0, %v885_v50  ;;  %v476_v3 = vadd.f32 %v475_v1, %v887_v51 }
 0x121   :  { %552 = vst [vmem:[#allocation7 + $0x20] sm:$0xff] %v361_v62  ;;  %554 = vst [vmem:[#allocation7 + $0x30] sm:$0xff] %v474_v63 }
 0x122   :  { %553 = vst [vmem:[#allocation7 + $0x28] sm:$0xff] %v363_v2  ;;  %555 = vst [vmem:[#allocation7 + $0x38] sm:$0xff] %v476_v3 }
 0x124   :  { %v366_v4 = vpop.f32.mrb[4].mxu0  ;;  %v479_v5 = vpop.f32.mrb[4].mxu1 }
 0x125   :  { %v367_v6 = vadd.f32 %v366_v4, %v881_v48  ;;  %v480_v7 = vadd.f32 %v479_v5, %v883_v49  ;;  %v368_v8 = vpop.f32.mrb[5].mxu0  ;;  %v481_v9 = vpop.f32.mrb[5].mxu1 }
 0x126   :  { %v369_v10 = vadd.f32 %v368_v8, %v885_v50  ;;  %v482_v11 = vadd.f32 %v481_v9, %v887_v51  ;;  %v370_v12 = vpop.f32.mrb[6].mxu0  ;;  %v483_v13 = vpop.f32.mrb[6].mxu1 }
 0x127   :  { %556 = vst [vmem:[#allocation7 + $0x40] sm:$0xff] %v367_v6  ;;  %558 = vst [vmem:[#allocation7 + $0x50] sm:$0xff] %v480_v7  ;;  %v371_v14 = vadd.f32 %v370_v12, %v881_v48  ;;  %v484_v15 = vadd.f32 %v483_v13, %v883_v49  ;;  %v372_v16 = vpop.f32.mrb[7].mxu0  ;;  %v485_v17 = vpop.f32.mrb[7].mxu1 }
 0x128   :  { %557 = vst [vmem:[#allocation7 + $0x48] sm:$0xff] %v369_v10  ;;  %559 = vst [vmem:[#allocation7 + $0x58] sm:$0xff] %v482_v11  ;;  %v373_v18 = vadd.f32 %v372_v16, %v885_v50  ;;  %v486_v19 = vadd.f32 %v485_v17, %v887_v51 }
 0x129   :  { %560 = vst [vmem:[#allocation7 + $0x60] sm:$0xff] %v371_v14  ;;  %562 = vst [vmem:[#allocation7 + $0x70] sm:$0xff] %v484_v15 }
 0x12a   :  { %561 = vst [vmem:[#allocation7 + $0x68] sm:$0xff] %v373_v18  ;;  %563 = vst [vmem:[#allocation7 + $0x78] sm:$0xff] %v486_v19 }
 0x12c   :  { %v376_v20 = vpop.f32.mrb[8].mxu0  ;;  %v489_v21 = vpop.f32.mrb[8].mxu1 }
 0x12d   :  { %v377_v22 = vadd.f32 %v376_v20, %v881_v48  ;;  %v490_v23 = vadd.f32 %v489_v21, %v883_v49  ;;  %v378_v24 = vpop.f32.mrb[9].mxu0  ;;  %v491_v25 = vpop.f32.mrb[9].mxu1 }
 0x12e   :  { %v379_v26 = vadd.f32 %v378_v24, %v885_v50  ;;  %v492_v27 = vadd.f32 %v491_v25, %v887_v51  ;;  %v380_v28 = vpop.f32.mrb[10].mxu0  ;;  %v493_v29 = vpop.f32.mrb[10].mxu1 }
 0x12f   :  { %564 = vst [vmem:[#allocation7 + $0x80] sm:$0xff] %v377_v22  ;;  %566 = vst [vmem:[#allocation7 + $0x90] sm:$0xff] %v490_v23  ;;  %v381_v30 = vadd.f32 %v380_v28, %v881_v48  ;;  %v494_v31 = vadd.f32 %v493_v29, %v883_v49  ;;  %v382_v32 = vpop.f32.mrb[11].mxu0  ;;  %v495_v33 = vpop.f32.mrb[11].mxu1 }
 0x130   :  { %565 = vst [vmem:[#allocation7 + $0x88] sm:$0xff] %v379_v26  ;;  %567 = vst [vmem:[#allocation7 + $0x98] sm:$0xff] %v492_v27  ;;  %v383_v34 = vadd.f32 %v382_v32, %v885_v50  ;;  %v496_v35 = vadd.f32 %v495_v33, %v887_v51 }
 0x131   :  { %568 = vst [vmem:[#allocation7 + $0xa0] sm:$0xff] %v381_v30  ;;  %570 = vst [vmem:[#allocation7 + $0xb0] sm:$0xff] %v494_v31 }
 0x132   :  { %569 = vst [vmem:[#allocation7 + $0xa8] sm:$0xff] %v383_v34  ;;  %571 = vst [vmem:[#allocation7 + $0xb8] sm:$0xff] %v496_v35 }
 0x134   :  { %v386_v36 = vpop.f32.mrb[12].mxu0  ;;  %v499_v37 = vpop.f32.mrb[12].mxu1 }
 0x135   :  { %v387_v38 = vadd.f32 %v386_v36, %v881_v48  ;;  %v500_v39 = vadd.f32 %v499_v37, %v883_v49  ;;  %v388_v40 = vpop.f32.mrb[13].mxu0  ;;  %v501_v41 = vpop.f32.mrb[13].mxu1 }
 0x136   :  { %v389_v42 = vadd.f32 %v388_v40, %v885_v50  ;;  %v502_v43 = vadd.f32 %v501_v41, %v887_v51  ;;  %v390_v44 = vpop.f32.mrb[14].mxu0  ;;  %v503_v45 = vpop.f32.mrb[14].mxu1 }
 0x137   :  { %572 = vst [vmem:[#allocation7 + $0xc0] sm:$0xff] %v387_v38  ;;  %574 = vst [vmem:[#allocation7 + $0xd0] sm:$0xff] %v500_v39  ;;  %v391_v46 = vadd.f32 %v390_v44, %v881_v48  ;;  %v504_v47 = vadd.f32 %v503_v45, %v883_v49  ;;  %v392_v52 = vpop.f32.mrb[15].mxu0  ;;  %v505_v53 = vpop.f32.mrb[15].mxu1 }
 0x138   :  { %573 = vst [vmem:[#allocation7 + $0xc8] sm:$0xff] %v389_v42  ;;  %575 = vst [vmem:[#allocation7 + $0xd8] sm:$0xff] %v502_v43  ;;  %v393_v54 = vadd.f32 %v392_v52, %v885_v50  ;;  %v506_v55 = vadd.f32 %v505_v53, %v887_v51 }
 0x139   :  { %576 = vst [vmem:[#allocation7 + $0xe0] sm:$0xff] %v391_v46  ;;  %578 = vst [vmem:[#allocation7 + $0xf0] sm:$0xff] %v504_v47 }
 0x13a   :  { %577 = vst [vmem:[#allocation7 + $0xe8] sm:$0xff] %v393_v54  ;;  %579 = vst [vmem:[#allocation7 + $0xf8] sm:$0xff] %v506_v55 }
 0x13c   :  { %v396_v56 = vpop.f32.mrb[16].mxu0  ;;  %v509_v57 = vpop.f32.mrb[16].mxu1 }
 0x13d   :  { %v397_v58 = vadd.f32 %v396_v56, %v881_v48  ;;  %v510_v59 = vadd.f32 %v509_v57, %v883_v49  ;;  %v398_v60 = vpop.f32.mrb[17].mxu0  ;;  %v511_v61 = vpop.f32.mrb[17].mxu1 }
 0x13e   :  { %v399_v62 = vadd.f32 %v398_v60, %v885_v50  ;;  %v512_v63 = vadd.f32 %v511_v61, %v887_v51  ;;  %v400_v0 = vpop.f32.mrb[18].mxu0  ;;  %v513_v1 = vpop.f32.mrb[18].mxu1 }
 0x13f   :  { %580 = vst [vmem:[#allocation7 + $0x100] sm:$0xff] %v397_v58  ;;  %582 = vst [vmem:[#allocation7 + $0x110] sm:$0xff] %v510_v59  ;;  %v401_v2 = vadd.f32 %v400_v0, %v881_v48  ;;  %v514_v3 = vadd.f32 %v513_v1, %v883_v49  ;;  %v402_v4 = vpop.f32.mrb[19].mxu0  ;;  %v515_v5 = vpop.f32.mrb[19].mxu1 }
 0x140   :  { %581 = vst [vmem:[#allocation7 + $0x108] sm:$0xff] %v399_v62  ;;  %583 = vst [vmem:[#allocation7 + $0x118] sm:$0xff] %v512_v63  ;;  %v403_v6 = vadd.f32 %v402_v4, %v885_v50  ;;  %v516_v7 = vadd.f32 %v515_v5, %v887_v51 }
 0x141   :  { %584 = vst [vmem:[#allocation7 + $0x120] sm:$0xff] %v401_v2  ;;  %586 = vst [vmem:[#allocation7 + $0x130] sm:$0xff] %v514_v3 }
 0x142   :  { %585 = vst [vmem:[#allocation7 + $0x128] sm:$0xff] %v403_v6  ;;  %587 = vst [vmem:[#allocation7 + $0x138] sm:$0xff] %v516_v7 }
 0x144   :  { %v406_v8 = vpop.f32.mrb[20].mxu0  ;;  %v519_v9 = vpop.f32.mrb[20].mxu1 }
 0x145   :  { %v407_v10 = vadd.f32 %v406_v8, %v881_v48  ;;  %v520_v11 = vadd.f32 %v519_v9, %v883_v49  ;;  %v408_v12 = vpop.f32.mrb[21].mxu0  ;;  %v521_v13 = vpop.f32.mrb[21].mxu1 }
 0x146   :  { %v409_v14 = vadd.f32 %v408_v12, %v885_v50  ;;  %v522_v15 = vadd.f32 %v521_v13, %v887_v51  ;;  %v410_v16 = vpop.f32.mrb[22].mxu0  ;;  %v523_v17 = vpop.f32.mrb[22].mxu1 }
 0x147   :  { %588 = vst [vmem:[#allocation7 + $0x140] sm:$0xff] %v407_v10  ;;  %590 = vst [vmem:[#allocation7 + $0x150] sm:$0xff] %v520_v11  ;;  %v411_v18 = vadd.f32 %v410_v16, %v881_v48  ;;  %v524_v19 = vadd.f32 %v523_v17, %v883_v49  ;;  %v412_v20 = vpop.f32.mrb[23].mxu0  ;;  %v525_v21 = vpop.f32.mrb[23].mxu1 }
 0x148   :  { %589 = vst [vmem:[#allocation7 + $0x148] sm:$0xff] %v409_v14  ;;  %591 = vst [vmem:[#allocation7 + $0x158] sm:$0xff] %v522_v15  ;;  %v413_v22 = vadd.f32 %v412_v20, %v885_v50  ;;  %v526_v23 = vadd.f32 %v525_v21, %v887_v51 }
 0x149   :  { %592 = vst [vmem:[#allocation7 + $0x160] sm:$0xff] %v411_v18  ;;  %594 = vst [vmem:[#allocation7 + $0x170] sm:$0xff] %v524_v19 }
 0x14a   :  { %593 = vst [vmem:[#allocation7 + $0x168] sm:$0xff] %v413_v22  ;;  %595 = vst [vmem:[#allocation7 + $0x178] sm:$0xff] %v526_v23 }
 0x14c   :  { %v416_v24 = vpop.f32.mrb[24].mxu0  ;;  %v529_v25 = vpop.f32.mrb[24].mxu1 }
 0x14d   :  { %v417_v26 = vadd.f32 %v416_v24, %v881_v48  ;;  %v530_v27 = vadd.f32 %v529_v25, %v883_v49  ;;  %v418_v28 = vpop.f32.mrb[25].mxu0  ;;  %v531_v29 = vpop.f32.mrb[25].mxu1 }
 0x14e   :  { %v419_v30 = vadd.f32 %v418_v28, %v885_v50  ;;  %v532_v31 = vadd.f32 %v531_v29, %v887_v51  ;;  %v420_v32 = vpop.f32.mrb[26].mxu0  ;;  %v533_v33 = vpop.f32.mrb[26].mxu1 }
 0x14f   :  { %596 = vst [vmem:[#allocation7 + $0x180] sm:$0xff] %v417_v26  ;;  %598 = vst [vmem:[#allocation7 + $0x190] sm:$0xff] %v530_v27  ;;  %v421_v34 = vadd.f32 %v420_v32, %v881_v48  ;;  %v534_v35 = vadd.f32 %v533_v33, %v883_v49  ;;  %v422_v36 = vpop.f32.mrb[27].mxu0  ;;  %v535_v37 = vpop.f32.mrb[27].mxu1 }
 0x150   :  { %597 = vst [vmem:[#allocation7 + $0x188] sm:$0xff] %v419_v30  ;;  %599 = vst [vmem:[#allocation7 + $0x198] sm:$0xff] %v532_v31  ;;  %v423_v38 = vadd.f32 %v422_v36, %v885_v50  ;;  %v536_v39 = vadd.f32 %v535_v37, %v887_v51 }
 0x151   :  { %600 = vst [vmem:[#allocation7 + $0x1a0] sm:$0xff] %v421_v34  ;;  %602 = vst [vmem:[#allocation7 + $0x1b0] sm:$0xff] %v534_v35 }
 0x152   :  { %601 = vst [vmem:[#allocation7 + $0x1a8] sm:$0xff] %v423_v38  ;;  %603 = vst [vmem:[#allocation7 + $0x1b8] sm:$0xff] %v536_v39 }
 0x154   :  { %v426_v40 = vpop.f32.mrb[28].mxu0  ;;  %v539_v41 = vpop.f32.mrb[28].mxu1 }
 0x155   :  { %v427_v42 = vadd.f32 %v426_v40, %v881_v48  ;;  %v540_v43 = vadd.f32 %v539_v41, %v883_v49  ;;  %v428_v44 = vpop.f32.mrb[29].mxu0  ;;  %v541_v45 = vpop.f32.mrb[29].mxu1 }
 0x156   :  { %v429_v46 = vadd.f32 %v428_v44, %v885_v50  ;;  %v542_v47 = vadd.f32 %v541_v45, %v887_v51  ;;  %v430_v52 = vpop.f32.mrb[30].mxu0  ;;  %v543_v53 = vpop.f32.mrb[30].mxu1 }
 0x157   :  { %604 = vst [vmem:[#allocation7 + $0x1c0] sm:$0xff] %v427_v42  ;;  %606 = vst [vmem:[#allocation7 + $0x1d0] sm:$0xff] %v540_v43  ;;  %v431_v54 = vadd.f32 %v430_v52, %v881_v48  ;;  %v544_v55 = vadd.f32 %v543_v53, %v883_v49  ;;  %v432_v56 = vpop.f32.mrb[31].mxu0  ;;  %v545_v57 = vpop.f32.mrb[31].mxu1 }
 0x158   :  { %605 = vst [vmem:[#allocation7 + $0x1c8] sm:$0xff] %v429_v46  ;;  %607 = vst [vmem:[#allocation7 + $0x1d8] sm:$0xff] %v542_v47  ;;  %v433_v58 = vadd.f32 %v432_v56, %v885_v50  ;;  %v546_v59 = vadd.f32 %v545_v57, %v887_v51 }
 0x159   :  { %608 = vst [vmem:[#allocation7 + $0x1e0] sm:$0xff] %v431_v54  ;;  %610 = vst [vmem:[#allocation7 + $0x1f0] sm:$0xff] %v544_v55 }
 0x15a   :  { %609 = vst [vmem:[#allocation7 + $0x1e8] sm:$0xff] %v433_v58  ;;  %611 = vst [vmem:[#allocation7 + $0x1f8] sm:$0xff] %v546_v59 }
 0x15b   :  { %791 = shalt.err (!%p788_p6)
}
 0x15c   :  { %s792_s17 = scalar_lea.hbm %s968_s3, 8192 }
 0x15d   :  { %p793_p7 = scmp.ne.s32.totalorder %s968_s3, %s792_s17  ;;  %p796_p8 = scmp.lt.u32.totalorder %s792_s17, %s968_s3 }
 0x15f   :  { %p798_p9 = pnand %p796_p8, %p793_p7 }
 0x161   :  { %801 = shalt.err (!%p798_p9)
}
 0x162   :  { %s816_s22 = smov 512   ;;  %s817_s23 = smov 32  }
 0x163   :  { %623 = dma.vmem_to_hbm [thread:$0]  %s618_s13, 8192, %s968_s3, [#allocation4], %s816_s22, %s816_s22, %s817_s23  }
 0x164   :  { %806 = dma.done.wait [#allocation4], 8192  }
 0x165   :  { %807 = vsyncadd [#allocation4], 4294959104 }
 0x166   :  { %627 = vsyncpa [#allocation3], 1 }
 0x167   :  { %628 = vsyncpa [#allocation6], 1 }
 0x168   :  { %629 = vsyncpa [#allocation4], 1 }

</bundles_post_ra>
